<compile_context>
chip_gen: v7x
topology: tpu7x:2x2x1
jax: 0.10.0
libtpu: 0.0.40
codegen_flags: <defaults>
</compile_context>

<pallas_src>
import functools

import jax
import jax.numpy as jnp
from jax.experimental import pallas as pl
from jax.experimental.pallas import tpu as pltpu


def upconv_conv_kernel(x_ref, w_ref, y_ref, s_ref, *, h, w):
    """Sub-pixel 3x3 conv on the 2x-upsampled grid + fused BN-stat epilogue.

    x_ref : (1, Cin, H*W)     bf16, original-resolution input, lane-dense spatial
    w_ref : (4*Cout, 9*Cin)   bf16, folded sub-pixel weights (phase-major rows)
    y_ref : (1, 4*Cout, H*W)  bf16, conv output (no bias; it cancels in BN)
    s_ref : (1, 4*Cout, 2)    f32, per-row [sum, sum of squares]
    """
    hw = h * w
    x = x_ref[0].astype(jnp.float32)                         # (Cin, HW)

    # Edge-validity masks on the flattened spatial (lane) axis.
    lane = jax.lax.broadcasted_iota(jnp.int32, (1, hw), 1)
    col = lane % w
    ok_up = lane >= w                 # row i-1 exists
    ok_dn = lane < hw - w             # row i+1 exists
    ok_lf = col >= 1                  # col j-1 exists
    ok_rt = col <= w - 2              # col j+1 exists

    # Shared 9-tap im2col built with lane rolls (XLU) + masked selects (VPU).
    taps = []
    for dy in range(3):
        for dx in range(3):
            off = (dy - 1) * w + (dx - 1)                     # flat offset of the tap
            t = x if off == 0 else pltpu.roll(x, shift=(-off) % hw, axis=1)
            m = None
            if dy == 0:
                m = ok_up
            elif dy == 2:
                m = ok_dn
            if dx == 0:
                m = ok_lf if m is None else m & ok_lf
            elif dx == 2:
                m = ok_rt if m is None else m & ok_rt
            if m is not None:
                t = jnp.where(m, t, 0.0)
            taps.append(t)
    pmat = jnp.concatenate(taps, axis=0).astype(jnp.bfloat16)   # (9*Cin, HW)

    # One fused matmul for all 4 sub-pixel phases (bf16 operands, f32 accumulate).
    acc = jnp.dot(w_ref[...], pmat,
                  preferred_element_type=jnp.float32)            # (4*Cout, HW)

    y_ref[0] = acc.astype(y_ref.dtype)
    # BN-statistics epilogue: dense lane-axis reductions.
    s_ref[0] = jnp.concatenate(
        [jnp.sum(acc, axis=1, keepdims=True),
         jnp.sum(acc * acc, axis=1, keepdims=True)], axis=1)      # (4*Cout, 2)


def bn_relu_kernel(y_ref, scale_ref, shift_ref, o_ref):
    """Streamed y*scale + shift, then ReLU, on one big lane-dense block."""
    y = y_ref[0].astype(jnp.float32)                          # (4*Cout, HW)
    out = y * scale_ref[...] + shift_ref[...]                 # (4*Cout,1) broadcasts
    o_ref[0] = jnp.maximum(out, 0.0).astype(o_ref.dtype)


def upconv_block(x_nchw, weight_oihw, bias, gamma, beta, eps=1e-5):
    """Pallas implementation of UpConvBlock.forward (NCHW in, NCHW out)."""
    del bias  # A constant per-channel bias cancels exactly under training-mode BN.
    n, cin, h, w = x_nchw.shape
    cout = weight_oihw.shape[0]
    hw = h * w

    # --- fold nearest-2x upsample into the 3x3 weights: 4 sub-pixel phases, each a
    #     (sparse) 3x3 conv on the ORIGINAL image; stack into one matmul LHS with
    #     zeros for the taps a phase does not use.
    fold = jnp.array([[[1., 0., 0.], [0., 1., 1.], [0., 0., 0.]],
                      [[0., 0., 0.], [1., 1., 0.], [0., 0., 1.]]],
                     jnp.float32)                               # (phase, dy, ky)
    w_eff = jnp.einsum('adk,bel,ockl->abodec', fold, fold,
                       weight_oihw.astype(jnp.float32))         # (2,2,O,3,3,C)
    w_stack = w_eff.reshape(4 * cout, 9 * cin).astype(jnp.bfloat16)

    x_flat = x_nchw.reshape(n, cin, hw).astype(jnp.bfloat16)

    # --- kernel 1: fused sub-pixel conv + BN-stat epilogue ---------------------
    conv_cost = pl.CostEstimate(
        flops=2 * n * (4 * cout) * (9 * cin) * hw,
        transcendentals=0,
        bytes_accessed=(2 * n * cin * hw + 2 * 4 * cout * 9 * cin
                        + 2 * n * 4 * cout * hw + 4 * n * 4 * cout * 2))
    y_phase, stats = pl.pallas_call(
        functools.partial(upconv_conv_kernel, h=h, w=w),
        out_shape=(jax.ShapeDtypeStruct((n, 4 * cout, hw), jnp.bfloat16),
                   jax.ShapeDtypeStruct((n, 4 * cout, 2), jnp.float32)),
        grid=(n,),
        in_specs=[
            pl.BlockSpec((1, cin, hw), lambda i: (i, 0, 0)),
            pl.BlockSpec((4 * cout, 9 * cin), lambda i: (0, 0)),
        ],
        out_specs=(
            pl.BlockSpec((1, 4 * cout, hw), lambda i: (i, 0, 0)),
            pl.BlockSpec((1, 4 * cout, 2), lambda i: (i, 0, 0)),
        ),
        compiler_params=pltpu.CompilerParams(
            dimension_semantics=("parallel",),
            vmem_limit_bytes=32 * 1024 * 1024),
        cost_estimate=conv_cost,
    )(x_flat, w_stack)

    # --- BN batch statistics (training mode, biased variance) from fused partials
    count = n * 4 * hw                               # = N * (2H) * (2W)
    tot = jnp.sum(stats.reshape(n, 4, cout, 2), axis=(0, 1))    # (Cout, 2)
    mean = tot[:, 0] / count
    var = tot[:, 1] / count - mean * mean
    scale = gamma.astype(jnp.float32) * jax.lax.rsqrt(var + eps)
    shift = beta.astype(jnp.float32) - mean * scale
    scale4 = jnp.tile(scale, 4).reshape(4 * cout, 1)
    shift4 = jnp.tile(shift, 4).reshape(4 * cout, 1)

    # --- kernel 2: streamed scale/shift + ReLU on one big lane-dense block -----
    bn_cost = pl.CostEstimate(
        flops=3 * n * 4 * cout * hw, transcendentals=0,
        bytes_accessed=2 * n * 4 * cout * hw + 4 * n * 4 * cout * hw)
    y_norm = pl.pallas_call(
        bn_relu_kernel,
        out_shape=jax.ShapeDtypeStruct((n, 4 * cout, hw), jnp.float32),
        grid=(n,),
        in_specs=[
            pl.BlockSpec((1, 4 * cout, hw), lambda i: (i, 0, 0)),
            pl.BlockSpec((4 * cout, 1), lambda i: (0, 0)),
            pl.BlockSpec((4 * cout, 1), lambda i: (0, 0)),
        ],
        out_specs=pl.BlockSpec((1, 4 * cout, hw), lambda i: (i, 0, 0)),
        compiler_params=pltpu.CompilerParams(
            dimension_semantics=("parallel",),
            vmem_limit_bytes=32 * 1024 * 1024),
        cost_estimate=bn_cost,
    )(y_phase, scale4, shift4)

    # --- interleave the 4 sub-pixel phases back to NCHW (single XLA transpose) --
    z = y_norm.reshape(n, 2, 2, cout, h, w)
    z = jnp.transpose(z, (0, 3, 4, 1, 5, 2))                 # (N,Cout,H,2,W,2)
    return z.reshape(n, cout, 2 * h, 2 * w)


def upconv_block_reference(x, weight, bias, gamma, beta, eps=1e-5):
    """Pure-JAX reference mirroring the PyTorch forward (training-mode BN)."""
    x_up = jnp.repeat(jnp.repeat(x, 2, axis=2), 2, axis=3)
    y = jax.lax.conv_general_dilated(
        x_up, weight, window_strides=(1, 1), padding=((1, 1), (1, 1)),
        dimension_numbers=("NCHW", "OIHW", "NCHW"))
    y = y + bias.reshape(1, -1, 1, 1)
    mean = jnp.mean(y, axis=(0, 2, 3), keepdims=True)
    var = jnp.mean((y - mean) ** 2, axis=(0, 2, 3), keepdims=True)
    y = (y - mean) * jax.lax.rsqrt(var + eps) * gamma.reshape(1, -1, 1, 1) \
        + beta.reshape(1, -1, 1, 1)
    return jnp.maximum(y, 0.0)


if __name__ == "__main__":
    key = jax.random.PRNGKey(0)
    k_x, k_w, k_b, k_g, k_bt = jax.random.split(key, 5)

    N, CH_IN, CH_OUT, H, W = 2, 4, 8, 16, 16

    x = jax.random.normal(k_x, (N, CH_IN, H, W), dtype=jnp.float32)
    weight = 0.1 * jax.random.normal(k_w, (CH_OUT, CH_IN, 3, 3), jnp.float32)
    bias = 0.1 * jax.random.normal(k_b, (CH_OUT,), jnp.float32)
    gamma = 1.0 + 0.1 * jax.random.normal(k_g, (CH_OUT,), jnp.float32)
    beta = 0.1 * jax.random.normal(k_bt, (CH_OUT,), jnp.float32)

    upconv = jax.jit(upconv_block)
    ref_fn = jax.jit(upconv_block_reference)

    out = jax.block_until_ready(upconv(x, weight, bias, gamma, beta))
    ref = jax.block_until_ready(ref_fn(x, weight, bias, gamma, beta))

    assert out.shape == (N, CH_OUT, 2 * H, 2 * W), out.shape
    # bf16 MXU operands + bf16 intermediate storage vs. the all-f32 reference,
    # hence the loosened tolerance (f32 path keeps < 1e-3).
    max_err = float(jnp.max(jnp.abs(out - ref)))
    assert max_err < 5e-2, max_err
    print("KERNEL_OK")
</pallas_src>

<mosaic_0001>
module attributes {stable_mosaic.version = 11 : i64} {
  func.func @upconv_conv_kernel(%arg0: i32, %arg1: memref<1x4x256xbf16, #tpu.memory_space<vmem>>, %arg2: memref<32x36xbf16, #tpu.memory_space<vmem>>, %arg3: memref<1x32x256xbf16, #tpu.memory_space<vmem>>, %arg4: memref<1x32x2xf32, #tpu.memory_space<vmem>>) attributes {dimension_semantics = [#tpu.dimension_semantics<parallel>], iteration_bounds = array<i64: 2>, scalar_prefetch = 0 : i64, scratch_operands = 0 : i64, tpu.core_type = #tpu.core_type<tc>, window_params = [{transform_indices = @transform_0, window_bounds = array<i64: 1, 4, 256>}, {pipeline_mode = #tpu.pipeline_mode<synchronous>, transform_indices = @transform_1, window_bounds = array<i64: 32, 36>}, {transform_indices = @transform_2, window_bounds = array<i64: 1, 32, 256>}, {transform_indices = @transform_3, window_bounds = array<i64: 1, 32, 2>}]} {
    %c0 = arith.constant 0 : index
    %c0_0 = arith.constant 0 : index
    %c0_1 = arith.constant 0 : index
    %0 = vector.load %arg1[%c0, %c0_0, %c0_1] : memref<1x4x256xbf16, #tpu.memory_space<vmem>>, vector<1x4x256xbf16>
    %1 = vector.shape_cast %0 : vector<1x4x256xbf16> to vector<4x256xbf16>
    %2 = arith.extf %1 : vector<4x256xbf16> to vector<4x256xf32>
    %3 = tpu.iota {dimensions = array<i32: 1>} : vector<1x256xi32>
    %c16_i32 = arith.constant 16 : i32
    %c0_i32 = arith.constant 0 : i32
    %4 = arith.cmpi eq, %c16_i32, %c0_i32 : i32
    %c1_i32 = arith.constant 1 : i32
    %5 = arith.select %4, %c1_i32, %c16_i32 : i32
    %6 = vector.broadcast %5 : i32 to vector<1x256xi32>
    %7 = arith.remsi %3, %6 : vector<1x256xi32>
    %c0_i32_2 = arith.constant 0 : i32
    %8 = vector.broadcast %c0_i32_2 : i32 to vector<1x256xi32>
    %9 = arith.cmpi ne, %7, %8 : vector<1x256xi32>
    %c0_i32_3 = arith.constant 0 : i32
    %10 = vector.broadcast %c0_i32_3 : i32 to vector<1x256xi32>
    %11 = arith.cmpi slt, %7, %10 : vector<1x256xi32>
    %c0_i32_4 = arith.constant 0 : i32
    %12 = arith.cmpi slt, %5, %c0_i32_4 : i32
    %13 = vector.broadcast %12 : i1 to vector<1x256xi1>
    %14 = vector.broadcast %13 : vector<1x256xi1> to vector<1x256xi1>
    %15 = arith.xori %11, %14 : vector<1x256xi1>
    %16 = arith.andi %15, %9 : vector<1x256xi1>
    %17 = vector.broadcast %5 : i32 to vector<1x256xi32>
    %18 = arith.addi %7, %17 : vector<1x256xi32>
    %19 = arith.select %16, %18, %7 : vector<1x256xi1>, vector<1x256xi32>
    %c16_i32_5 = arith.constant 16 : i32
    %20 = vector.broadcast %c16_i32_5 : i32 to vector<1x256xi32>
    %21 = arith.cmpi sge, %3, %20 : vector<1x256xi32>
    %c240_i32 = arith.constant 240 : i32
    %22 = vector.broadcast %c240_i32 : i32 to vector<1x256xi32>
    %23 = arith.cmpi slt, %3, %22 : vector<1x256xi32>
    %c1_i32_6 = arith.constant 1 : i32
    %24 = vector.broadcast %c1_i32_6 : i32 to vector<1x256xi32>
    %25 = arith.cmpi sge, %19, %24 : vector<1x256xi32>
    %c14_i32 = arith.constant 14 : i32
    %26 = vector.broadcast %c14_i32 : i32 to vector<1x256xi32>
    %27 = arith.cmpi sle, %19, %26 : vector<1x256xi32>
    %c17_i32 = arith.constant 17 : i32
    %28 = tpu.dynamic_rotate %2 by %c17_i32 dim 1 : vector<4x256xf32>, i32 -> vector<4x256xf32>
    %29 = arith.andi %21, %25 : vector<1x256xi1>
    %cst = arith.constant 0.000000e+00 : f32
    %30 = vector.shape_cast %29 : vector<1x256xi1> to vector<1x256xi1>
    %31 = vector.broadcast %30 : vector<1x256xi1> to vector<4x256xi1>
    %32 = vector.broadcast %cst : f32 to vector<4x256xf32>
    %33 = arith.select %31, %28, %32 : vector<4x256xi1>, vector<4x256xf32>
    %c16_i32_7 = arith.constant 16 : i32
    %34 = tpu.dynamic_rotate %2 by %c16_i32_7 dim 1 : vector<4x256xf32>, i32 -> vector<4x256xf32>
    %cst_8 = arith.constant 0.000000e+00 : f32
    %35 = vector.shape_cast %21 : vector<1x256xi1> to vector<1x256xi1>
    %36 = vector.broadcast %35 : vector<1x256xi1> to vector<4x256xi1>
    %37 = vector.broadcast %cst_8 : f32 to vector<4x256xf32>
    %38 = arith.select %36, %34, %37 : vector<4x256xi1>, vector<4x256xf32>
    %c15_i32 = arith.constant 15 : i32
    %39 = tpu.dynamic_rotate %2 by %c15_i32 dim 1 : vector<4x256xf32>, i32 -> vector<4x256xf32>
    %40 = arith.andi %21, %27 : vector<1x256xi1>
    %cst_9 = arith.constant 0.000000e+00 : f32
    %41 = vector.shape_cast %40 : vector<1x256xi1> to vector<1x256xi1>
    %42 = vector.broadcast %41 : vector<1x256xi1> to vector<4x256xi1>
    %43 = vector.broadcast %cst_9 : f32 to vector<4x256xf32>
    %44 = arith.select %42, %39, %43 : vector<4x256xi1>, vector<4x256xf32>
    %c1_i32_10 = arith.constant 1 : i32
    %45 = tpu.dynamic_rotate %2 by %c1_i32_10 dim 1 : vector<4x256xf32>, i32 -> vector<4x256xf32>
    %cst_11 = arith.constant 0.000000e+00 : f32
    %46 = vector.shape_cast %25 : vector<1x256xi1> to vector<1x256xi1>
    %47 = vector.broadcast %46 : vector<1x256xi1> to vector<4x256xi1>
    %48 = vector.broadcast %cst_11 : f32 to vector<4x256xf32>
    %49 = arith.select %47, %45, %48 : vector<4x256xi1>, vector<4x256xf32>
    %c255_i32 = arith.constant 255 : i32
    %50 = tpu.dynamic_rotate %2 by %c255_i32 dim 1 : vector<4x256xf32>, i32 -> vector<4x256xf32>
    %cst_12 = arith.constant 0.000000e+00 : f32
    %51 = vector.shape_cast %27 : vector<1x256xi1> to vector<1x256xi1>
    %52 = vector.broadcast %51 : vector<1x256xi1> to vector<4x256xi1>
    %53 = vector.broadcast %cst_12 : f32 to vector<4x256xf32>
    %54 = arith.select %52, %50, %53 : vector<4x256xi1>, vector<4x256xf32>
    %c241_i32 = arith.constant 241 : i32
    %55 = tpu.dynamic_rotate %2 by %c241_i32 dim 1 : vector<4x256xf32>, i32 -> vector<4x256xf32>
    %56 = arith.andi %23, %25 : vector<1x256xi1>
    %cst_13 = arith.constant 0.000000e+00 : f32
    %57 = vector.shape_cast %56 : vector<1x256xi1> to vector<1x256xi1>
    %58 = vector.broadcast %57 : vector<1x256xi1> to vector<4x256xi1>
    %59 = vector.broadcast %cst_13 : f32 to vector<4x256xf32>
    %60 = arith.select %58, %55, %59 : vector<4x256xi1>, vector<4x256xf32>
    %c240_i32_14 = arith.constant 240 : i32
    %61 = tpu.dynamic_rotate %2 by %c240_i32_14 dim 1 : vector<4x256xf32>, i32 -> vector<4x256xf32>
    %cst_15 = arith.constant 0.000000e+00 : f32
    %62 = vector.shape_cast %23 : vector<1x256xi1> to vector<1x256xi1>
    %63 = vector.broadcast %62 : vector<1x256xi1> to vector<4x256xi1>
    %64 = vector.broadcast %cst_15 : f32 to vector<4x256xf32>
    %65 = arith.select %63, %61, %64 : vector<4x256xi1>, vector<4x256xf32>
    %c239_i32 = arith.constant 239 : i32
    %66 = tpu.dynamic_rotate %2 by %c239_i32 dim 1 : vector<4x256xf32>, i32 -> vector<4x256xf32>
    %67 = arith.andi %23, %27 : vector<1x256xi1>
    %cst_16 = arith.constant 0.000000e+00 : f32
    %68 = vector.shape_cast %67 : vector<1x256xi1> to vector<1x256xi1>
    %69 = vector.broadcast %68 : vector<1x256xi1> to vector<4x256xi1>
    %70 = vector.broadcast %cst_16 : f32 to vector<4x256xf32>
    %71 = arith.select %69, %66, %70 : vector<4x256xi1>, vector<4x256xf32>
    %72 = tpu.concatenate %33, %38, %44, %49, %2, %54, %60, %65, %71 in 0 : vector<4x256xf32>, vector<4x256xf32>, vector<4x256xf32>, vector<4x256xf32>, vector<4x256xf32>, vector<4x256xf32>, vector<4x256xf32>, vector<4x256xf32>, vector<4x256xf32> -> vector<36x256xf32>
    %73 = arith.truncf %72 : vector<36x256xf32> to vector<36x256xbf16>
    %c0_17 = arith.constant 0 : index
    %c0_18 = arith.constant 0 : index
    %74 = vector.load %arg2[%c0_17, %c0_18] : memref<32x36xbf16, #tpu.memory_space<vmem>>, vector<32x36xbf16>
    %cst_19 = arith.constant dense<0.000000e+00> : vector<32x256xf32>
    %75 = tpu.matmul %74, %73, %cst_19 {dimension_numbers = #tpu.dot_dimension_numbers<[1], [0], [0], [1], [0, 0, 1, 1], [], []>} : vector<32x36xbf16>, vector<36x256xbf16>, vector<32x256xf32> -> vector<32x256xf32>
    %76 = arith.truncf %75 : vector<32x256xf32> to vector<32x256xbf16>
    %c0_20 = arith.constant 0 : index
    %c0_21 = arith.constant 0 : index
    %c0_22 = arith.constant 0 : index
    %77 = vector.load %arg3[%c0_20, %c0_21, %c0_22] : memref<1x32x256xbf16, #tpu.memory_space<vmem>>, vector<1x32x256xbf16>
    %78 = vector.shape_cast %77 : vector<1x32x256xbf16> to vector<32x256xbf16>
    %79 = vector.shape_cast %76 : vector<32x256xbf16> to vector<1x32x256xbf16>
    tpu.vector_store %arg3[%c0_20, %c0_21, %c0_22], %79 {strides = array<i32>} : memref<1x32x256xbf16, #tpu.memory_space<vmem>>, vector<1x32x256xbf16>,
    %cst_23 = arith.constant dense<0.000000e+00> : vector<32xf32>
    %80 = vector.multi_reduction <add>, %75, %cst_23 [1] : vector<32x256xf32> to vector<32xf32>
    %81 = vector.shape_cast %80 : vector<32xf32> to vector<32x1xf32>
    %82 = arith.mulf %75, %75 : vector<32x256xf32>
    %cst_24 = arith.constant dense<0.000000e+00> : vector<32xf32>
    %83 = vector.multi_reduction <add>, %82, %cst_24 [1] : vector<32x256xf32> to vector<32xf32>
    %84 = vector.shape_cast %83 : vector<32xf32> to vector<32x1xf32>
    %85 = tpu.concatenate %81, %84 in 1 : vector<32x1xf32>, vector<32x1xf32> -> vector<32x2xf32>
    %c0_25 = arith.constant 0 : index
    %c0_26 = arith.constant 0 : index
    %c0_27 = arith.constant 0 : index
    %86 = vector.load %arg4[%c0_25, %c0_26, %c0_27] : memref<1x32x2xf32, #tpu.memory_space<vmem>>, vector<1x32x2xf32>
    %87 = vector.shape_cast %86 : vector<1x32x2xf32> to vector<32x2xf32>
    %88 = vector.shape_cast %85 : vector<32x2xf32> to vector<1x32x2xf32>
    tpu.vector_store %arg4[%c0_25, %c0_26, %c0_27], %88 {strides = array<i32>} : memref<1x32x2xf32, #tpu.memory_space<vmem>>, vector<1x32x2xf32>,
    return
  }
  func.func @transform_0(%arg0: i32) -> (i32, i32, i32) {
    %c0_i32 = arith.constant 0 : i32
    %c0_i32_0 = arith.constant 0 : i32
    %c0_i32_1 = arith.constant 0 : i32
    return %arg0, %c0_i32, %c0_i32_0 : i32, i32, i32
  }
  func.func @transform_1(%arg0: i32) -> (i32, i32) {
    %c0_i32 = arith.constant 0 : i32
    %c0_i32_0 = arith.constant 0 : i32
    %c0_i32_1 = arith.constant 0 : i32
    return %c0_i32, %c0_i32_0 : i32, i32
  }
  func.func @transform_2(%arg0: i32) -> (i32, i32, i32) {
    %c0_i32 = arith.constant 0 : i32
    %c0_i32_0 = arith.constant 0 : i32
    %c0_i32_1 = arith.constant 0 : i32
    return %arg0, %c0_i32, %c0_i32_0 : i32, i32, i32
  }
  func.func @transform_3(%arg0: i32) -> (i32, i32, i32) {
    %c0_i32 = arith.constant 0 : i32
    %c0_i32_0 = arith.constant 0 : i32
    %c0_i32_1 = arith.constant 0 : i32
    return %arg0, %c0_i32, %c0_i32_0 : i32, i32, i32
  }
}

module attributes {stable_mosaic.version = 11 : i64} {
  func.func @bn_relu_kernel(%arg0: i32, %arg1: memref<1x32x256xbf16, #tpu.memory_space<vmem>>, %arg2: memref<32x1xf32, #tpu.memory_space<vmem>>, %arg3: memref<32x1xf32, #tpu.memory_space<vmem>>, %arg4: memref<1x32x256xf32, #tpu.memory_space<vmem>>) attributes {dimension_semantics = [#tpu.dimension_semantics<parallel>], iteration_bounds = array<i64: 2>, scalar_prefetch = 0 : i64, scratch_operands = 0 : i64, tpu.core_type = #tpu.core_type<tc>, window_params = [{transform_indices = @transform_0, window_bounds = array<i64: 1, 32, 256>}, {pipeline_mode = #tpu.pipeline_mode<synchronous>, transform_indices = @transform_1, window_bounds = array<i64: 32, 1>}, {pipeline_mode = #tpu.pipeline_mode<synchronous>, transform_indices = @transform_2, window_bounds = array<i64: 32, 1>}, {transform_indices = @transform_3, window_bounds = array<i64: 1, 32, 256>}]} {
    %c0 = arith.constant 0 : index
    %c0_0 = arith.constant 0 : index
    %c0_1 = arith.constant 0 : index
    %0 = vector.load %arg1[%c0, %c0_0, %c0_1] : memref<1x32x256xbf16, #tpu.memory_space<vmem>>, vector<1x32x256xbf16>
    %1 = vector.shape_cast %0 : vector<1x32x256xbf16> to vector<32x256xbf16>
    %2 = arith.extf %1 : vector<32x256xbf16> to vector<32x256xf32>
    %c0_2 = arith.constant 0 : index
    %c0_3 = arith.constant 0 : index
    %3 = vector.load %arg2[%c0_2, %c0_3] : memref<32x1xf32, #tpu.memory_space<vmem>>, vector<32x1xf32>
    %4 = vector.broadcast %3 : vector<32x1xf32> to vector<32x256xf32>
    %5 = arith.mulf %2, %4 : vector<32x256xf32>
    %c0_4 = arith.constant 0 : index
    %c0_5 = arith.constant 0 : index
    %6 = vector.load %arg3[%c0_4, %c0_5] : memref<32x1xf32, #tpu.memory_space<vmem>>, vector<32x1xf32>
    %7 = vector.broadcast %6 : vector<32x1xf32> to vector<32x256xf32>
    %8 = arith.addf %5, %7 : vector<32x256xf32>
    %cst = arith.constant 0.000000e+00 : f32
    %9 = vector.broadcast %cst : f32 to vector<32x256xf32>
    %10 = arith.maximumf %8, %9 : vector<32x256xf32>
    %c0_6 = arith.constant 0 : index
    %c0_7 = arith.constant 0 : index
    %c0_8 = arith.constant 0 : index
    %11 = vector.load %arg4[%c0_6, %c0_7, %c0_8] : memref<1x32x256xf32, #tpu.memory_space<vmem>>, vector<1x32x256xf32>
    %12 = vector.shape_cast %11 : vector<1x32x256xf32> to vector<32x256xf32>
    %13 = vector.shape_cast %10 : vector<32x256xf32> to vector<1x32x256xf32>
    tpu.vector_store %arg4[%c0_6, %c0_7, %c0_8], %13 {strides = array<i32>} : memref<1x32x256xf32, #tpu.memory_space<vmem>>, vector<1x32x256xf32>,
    return
  }
  func.func @transform_0(%arg0: i32) -> (i32, i32, i32) {
    %c0_i32 = arith.constant 0 : i32
    %c0_i32_0 = arith.constant 0 : i32
    %c0_i32_1 = arith.constant 0 : i32
    return %arg0, %c0_i32, %c0_i32_0 : i32, i32, i32
  }
  func.func @transform_1(%arg0: i32) -> (i32, i32) {
    %c0_i32 = arith.constant 0 : i32
    %c0_i32_0 = arith.constant 0 : i32
    %c0_i32_1 = arith.constant 0 : i32
    return %c0_i32, %c0_i32_0 : i32, i32
  }
  func.func @transform_2(%arg0: i32) -> (i32, i32) {
    %c0_i32 = arith.constant 0 : i32
    %c0_i32_0 = arith.constant 0 : i32
    %c0_i32_1 = arith.constant 0 : i32
    return %c0_i32, %c0_i32_0 : i32, i32
  }
  func.func @transform_3(%arg0: i32) -> (i32, i32, i32) {
    %c0_i32 = arith.constant 0 : i32
    %c0_i32_0 = arith.constant 0 : i32
    %c0_i32_1 = arith.constant 0 : i32
    return %arg0, %c0_i32, %c0_i32_0 : i32, i32, i32
  }
}

</mosaic_0001>

<bundles_post_ra>
// kernel: tile.18
= control target key start
LH: loop header
LB: loop body
LE: loop exit
PB: predicated region body
PF: predicated region fallthrough
CT: control target
= control target key end

     0   :  { %s22_s0 = inlined_call_operand.vmem [shape: f32[8], index: 0, kind: input, shape index: {}]   ;;  %s23_s1 = inlined_call_operand.vmem [shape: f32[4,8], index: 1, kind: output, shape index: {}]  }
   0x1   :  { %v4_v0 = vld [vmem:[%s22_s0] ss:$0 sm:$0xff] }
   0x2   :  { %5 = vst [vmem:[%s23_s1] sm:$0xf] %v4_v0 }

// kernel: tile.0
= control target key start
LH: loop header
LB: loop body
LE: loop exit
PB: predicated region body
PF: predicated region fallthrough
CT: control target
= control target key end

     0   :  { %s66_s8 = smov 125   ;;  %vm7_vm0 = vcmask 7168   ;;  %s67_s11 = smov 126   ;;  %s117_s0 = inlined_call_operand.vmem [shape: f32[4,8], index: 0, kind: input, shape index: {}]   ;;  %s118_s1 = inlined_call_operand.vmem [shape: f32[32,1], index: 1, kind: output, shape index: {}]  }
   0x1   :  { %v4_v0 = vld [vmem:[%s117_s0] sm:$0xf]  ;;  %s65_s0 = smov 127   ;;  %s68_s12 = smov 124  }
   0x2   :  { %5 = vst [vmem:[#allocation0] sm:$0xf] %v4_v0  ;;  %s69_s13 = smov 123   ;;  %s70_s14 = smov 122  }
   0x3   :  { %s71_s15 = smov 121  }
   0x9   :  { %v9_v1 = vld [vmem:[#allocation0] sm:$0xf]  }
   0xa   :  { %v21_v2 = vld [vmem:[#allocation0] sm:$0xf]   ;;  %10 = vrot.lane.b32.xlu0 %v9_v1, %s65_s0 }
   0xb   :  { %22 = vrot.lane.b32.xlu1 %v21_v2, %s66_s8  ;;  %v15_v3 = vld [vmem:[#allocation0] sm:$0xf]  }
   0xc   :  { %v27_v4 = vld [vmem:[#allocation0] sm:$0xf]  }
   0xd   :  { %v6_v5 = vld [vmem:[#allocation0] sm:$0xf]  }
   0xe   :  { %8 = vst.msk [vmem:[%s118_s1] ss:$8 sm:$0xf] %vm7_vm0, %v6_v5   ;;  %16 = vrot.lane.b32.xlu0 %v15_v3, %s67_s11  ;;  %v33_v6 = vld [vmem:[#allocation0] sm:$0xf]  }
   0xf   :  { %28 = vrot.lane.b32.xlu1 %v27_v4, %s68_s12  ;;  %v39_v7 = vld [vmem:[#allocation0] sm:$0xf]  }
  0x10   :  { %v45_v8 = vld [vmem:[#allocation0] sm:$0xf]  }
  0x12   :  { %34 = vrot.lane.b32.xlu0 %v33_v6, %s69_s13 }
  0x13   :  { %40 = vrot.lane.b32.xlu1 %v39_v7, %s70_s14 }
  0x16   :  { %46 = vrot.lane.b32.xlu0 %v45_v8, %s71_s15 }
  0x7c   :  { %v11_v9 = vpop.permute.xlu0 %10  }
  0x7d   :  { %v23_v10 = vpop.permute.xlu1 %22   ;;  %51 = vst.msk [vmem:[%s118_s1 + $0x1] ss:$8 sm:$0xf] %vm7_vm0, %v11_v9  }
  0x7e   :  { %53 = vst.msk [vmem:[%s118_s1 + $0x3] ss:$8 sm:$0xf] %vm7_vm0, %v23_v10  }
  0x80   :  { %v17_v11 = vpop.permute.xlu0 %16  }
  0x81   :  { %v29_v12 = vpop.permute.xlu1 %28   ;;  %52 = vst.msk [vmem:[%s118_s1 + $0x2] ss:$8 sm:$0xf] %vm7_vm0, %v17_v11  }
  0x82   :  { %54 = vst.msk [vmem:[%s118_s1 + $0x4] ss:$8 sm:$0xf] %vm7_vm0, %v29_v12  }
  0x84   :  { %v35_v13 = vpop.permute.xlu0 %34  }
  0x85   :  { %v41_v14 = vpop.permute.xlu1 %40   ;;  %55 = vst.msk [vmem:[%s118_s1 + $0x5] ss:$8 sm:$0xf] %vm7_vm0, %v35_v13  }
  0x86   :  { %56 = vst.msk [vmem:[%s118_s1 + $0x6] ss:$8 sm:$0xf] %vm7_vm0, %v41_v14  }
  0x88   :  { %v47_v15 = vpop.permute.xlu0 %46  }
  0x89   :  { %57 = vst.msk [vmem:[%s118_s1 + $0x7] ss:$8 sm:$0xf] %vm7_vm0, %v47_v15  }

// kernel: upconv_block.3
= control target key start
LH: loop header
LB: loop body
LE: loop exit
PB: predicated region body
PF: predicated region fallthrough
CT: control target
= control target key end

     0   :  { %s371_s12 = smov 0   ;;  %s416_s0 = inlined_call_operand.vmem [shape: bf16[2,32,256], index: 0, kind: input, shape index: {}]   ;;  %s417_s1 = inlined_call_operand.vmem [shape: f32[32,1], index: 1, kind: input, shape index: {}]   ;;  %s418_s2 = inlined_call_operand.vmem [shape: f32[32,1], index: 2, kind: input, shape index: {}]   ;;  %s419_s3 = inlined_call_operand.vmem [shape: f32[2,32,256], index: 3, kind: output, shape index: {}]  }
   0x1 LB: > { %s318_s13 = sadd.s32 4294967295, %s348_s12   ;;  %p322_p0 = scmp.ge.s32.totalorder %s348_s12, 1  ;;  %s348_s12 = sphi %s371_s12, %s13_s12  }
   0x2   : > { %p137_p1 = scmp.lt.s32.totalorder %s348_s12, 3 }
   0x4   : > { %p138_p2 = pnand %p322_p0, %p137_p1 }
   0x5   : > { %v185_v0 = vld [vmem:[%s417_s1 + $0x10] sm:$0xff] (!%p138_p2)  ;;  %v183_v1 = vld [vmem:[%s417_s1] sm:$0xff] (!%p138_p2)  ;;  %v350_v2 = vmov (!%p138_p2), 0   ;;  %v186_v3 = vld [vmem:[%s417_s1 + $0x18] sm:$0xff] (!%p138_p2)  ;;  %p161_p3 = scmp.lt.s32.totalorder (!%p138_p2), %s318_s13, 1 }
   0x6   : > { %141 = sbr.rel (%p138_p2) target bundleno = 153 (0x99), region = 32  ;;  %341 = vset.pattern.permute.xlu1 (!%p138_p2), %v350_v2  ;;  %340 = vset.pattern.permute.xlu0 (!%p138_p2), %v350_v2  ;;  %v184_v4 = vld [vmem:[%s417_s1 + $0x8] sm:$0xff] (!%p138_p2)  ;;  %v215_v6 = vld [vmem:[%s418_s2] sm:$0xff] (!%p138_p2)  ;;  %v218_v7 = vld [vmem:[%s418_s2 + $0x18] sm:$0xff] (!%p138_p2) }
   0x7   : > { %199 = vperm.xlu1 (!%p138_p2), %341, %v185_v0   ;;  %189 = vperm.xlu0 (!%p138_p2), %340, %v183_v1   ;;  %v216_v5 = vld [vmem:[%s418_s2 + $0x8] sm:$0xff] (!%p138_p2)  ;;  %v217_v8 = vld [vmem:[%s418_s2 + $0x10] sm:$0xff] (!%p138_p2) }
   0xb   : > { %204 = vperm.xlu1 (!%p138_p2), %341, %v186_v3   ;;  %194 = vperm.xlu0 (!%p138_p2), %340, %v184_v4  }
   0xd   : > { %s421_s13 = smov (!%p161_p3, %s318_s13), 1 }
   0xe   : > { %s329_s30 = sshll.u32 %s421_s13, 5  ;;  %s330_s7 = sshll.u32 %s421_s13, 6 }
   0xf   : > { %226 = vperm.xlu1 %341, %v216_v5   ;;  %221 = vperm.xlu0 %340, %v215_v6   ;;  %s165_s6 = scalar_lea.vmem %s416_s0, %s329_s30  ;;  %s170_s10 = scalar_lea.vmem %s419_s3, %s330_s7 }
  0x10   : > { %v171_v11 = vld [vmem:[%s165_s6] sm:$0xff]  ;;  %v172_v12 = vld [vmem:[%s165_s6 + $0x8] sm:$0xff]  ;;  %v173_v13 = vld [vmem:[%s165_s6 + $0x10] sm:$0xff] }
  0x11   : > { %v175_v14 = vunpack.c.l.bf16 %v171_v11  ;;  %v176_v15 = vunpack.c.h.bf16 %v171_v11  ;;  %v174_v16 = vld [vmem:[%s165_s6 + $0x18] sm:$0xff]  ;;  %v177_v17 = vunpack.c.l.bf16 %v172_v12  ;;  %v178_v18 = vunpack.c.h.bf16 %v172_v12 }
  0x12   : > { %v179_v21 = vunpack.c.l.bf16 %v173_v13  ;;  %v180_v22 = vunpack.c.h.bf16 %v173_v13  ;;  %v181_v23 = vunpack.c.l.bf16 %v174_v16  ;;  %v182_v24 = vunpack.c.h.bf16 %v174_v16 }
  0x13   : > { %236 = vperm.xlu1 %341, %v218_v7   ;;  %231 = vperm.xlu0 %340, %v217_v8  }
  0x86   : > { %v200_v9 = vpop.permute.xlu1 %199  ;;  %v190_v10 = vpop.permute.xlu0 %189 }
  0x87   : > { %v207_v25 = vmul.f32 %v190_v10, %v175_v14  ;;  %v208_v26 = vmul.f32 %v190_v10, %v176_v15  ;;  %v211_v35 = vmul.f32 %v200_v9, %v179_v21  ;;  %v212_v36 = vmul.f32 %v200_v9, %v180_v22 }
  0x8a   : > { %v205_v19 = vpop.permute.xlu1 %204  ;;  %v195_v20 = vpop.permute.xlu0 %194 }
  0x8b   : > { %v209_v27 = vmul.f32 %v195_v20, %v177_v17  ;;  %v210_v28 = vmul.f32 %v195_v20, %v178_v18  ;;  %v213_v37 = vmul.f32 %v205_v19, %v181_v23  ;;  %v214_v38 = vmul.f32 %v205_v19, %v182_v24 }
  0x8e   : > { %v227_v29 = vpop.permute.xlu1 %226  ;;  %v222_v30 = vpop.permute.xlu0 %221 }
  0x8f   : > { %v241_v31 = vadd.f32 %v227_v29, %v209_v27  ;;  %v242_v32 = vadd.f32 %v227_v29, %v210_v28  ;;  %v239_v33 = vadd.f32 %v222_v30, %v207_v25  ;;  %v240_v34 = vadd.f32 %v222_v30, %v208_v26 }
  0x91   : > { %v249_v39 = vmax.f32 %v241_v31, 0.0  ;;  %v250_v40 = vmax.f32 %v242_v32, 0.0  ;;  %v247_v41 = vmax.f32 %v239_v33, 0.0  ;;  %v248_v42 = vmax.f32 %v240_v34, 0.0 }
  0x92   : > { %v237_v43 = vpop.permute.xlu1 %236  ;;  %v232_v44 = vpop.permute.xlu0 %231 }
  0x93   : > { %257 = vst [vmem:[%s170_s10 + $0x10] sm:$0xff] %v249_v39  ;;  %258 = vst [vmem:[%s170_s10 + $0x18] sm:$0xff] %v250_v40  ;;  %v245_v45 = vadd.f32 %v237_v43, %v213_v37  ;;  %v246_v46 = vadd.f32 %v237_v43, %v214_v38  ;;  %v243_v47 = vadd.f32 %v232_v44, %v211_v35 }
  0x94   : > { %255 = vst [vmem:[%s170_s10] sm:$0xff] %v247_v41  ;;  %256 = vst [vmem:[%s170_s10 + $0x8] sm:$0xff] %v248_v42  ;;  %v244_v48 = vadd.f32 %v232_v44, %v212_v36 }
  0x95   : > { %v253_v49 = vmax.f32 %v245_v45, 0.0  ;;  %v254_v50 = vmax.f32 %v246_v46, 0.0  ;;  %v251_v51 = vmax.f32 %v243_v47, 0.0 }
  0x96   : > { %v252_v52 = vmax.f32 %v244_v48, 0.0 }
  0x97   : > { %261 = vst [vmem:[%s170_s10 + $0x30] sm:$0xff] %v253_v49  ;;  %262 = vst [vmem:[%s170_s10 + $0x38] sm:$0xff] %v254_v50 }
  0x98   : > { %259 = vst [vmem:[%s170_s10 + $0x20] sm:$0xff] %v251_v51  ;;  %260 = vst [vmem:[%s170_s10 + $0x28] sm:$0xff] %v252_v52 }
  0x99 PF: > { %s13_s12 = sadd.s32 1, %s348_s12  }
  0x9a   : > { %p10_p4 = scmp.ge.s32.totalorder %s13_s12, 4  }
  0x9c   :  { %12 = sbr.rel (!%p10_p4) target bundleno = 1 (0x1), region = 62 }

// kernel: upconv_block.2
= control target key start
LH: loop header
LB: loop body
LE: loop exit
PB: predicated region body
PF: predicated region fallthrough
CT: control target
= control target key end

     0   :  { %s746_s12 = smov 0   ;;  %s917_s0 = inlined_call_operand.vmem [shape: bf16[2,4,256], index: 0, kind: input, shape index: {}]   ;;  %s918_s1 = inlined_call_operand.vmem [shape: bf16[32,36], index: 1, kind: input, shape index: {}]   ;;  %s919_s2 = inlined_call_operand.vmem [shape: bf16[2,32,256], index: 2, kind: output, shape index: {0}]   ;;  %s920_s3 = inlined_call_operand.vmem [shape: f32[2,32,2], index: 3, kind: output, shape index: {1}]  }
   0x1 LB: > { %s615_s13 = sadd.s32 4294967295, %s715_s12   ;;  %p619_p0 = scmp.ge.s32.totalorder %s715_s12, 1  ;;  %s715_s12 = sphi %s746_s12, %s14_s12  }
   0x2   : > { %p140_p1 = scmp.lt.s32.totalorder %s715_s12, 3 }
   0x4   : > { %p141_p2 = pnand %p619_p0, %p140_p1 }
   0x5   : > { %p169_p3 = scmp.lt.s32.totalorder (!%p141_p2), %s615_s13, 1  ;;  %s717_s18 = smov (!%p141_p2), 17   ;;  %v725_v4 = vmov (!%p141_p2), 0   ;;  %v187_v5 = vlaneseq (!%p141_p2)  ;;  %vm361_vm11 = vcmask (!%p141_p2), 1043456  }
   0x6   : > { %144 = sbr.rel (%p141_p2) target bundleno = 540 (0x21c), region = 28  ;;  %s718_s19 = smov (!%p141_p2), 1   ;;  %436 = vmatprep.mubr.bf16.mxu0 (!%p141_p2), %v725_v4  ;;  %446 = vmatprep.mubr.bf16.mxu1 (!%p141_p2), %v725_v4 }
   0x7   : > { %s719_s20 = smov (!%p141_p2), 15   ;;  %s720_s21 = smov (!%p141_p2), 16   ;;  %v768_v6 = vand.u32 (!%p141_p2), 127, %v187_v5 }
   0x8   : > { %s721_s22 = smov (!%p141_p2), 127   ;;  %s722_s23 = smov (!%p141_p2), 112  }
   0x9   : > { %s723_s24 = smov (!%p141_p2), 113   ;;  %s724_s25 = smov (!%p141_p2), 111   ;;  %v771_v7 = vadd.s32 (!%p141_p2), 128, %v768_v6  ;;  %v194_v8 = vand.u32 (!%p141_p2), 15, %v768_v6  ;;  %vm272_vm0 = vcmp.lt.s32.totalorder (!%p141_p2), %v768_v6, 1  ;;  %vm244_vm1 = vcmp.lt.s32.totalorder (!%p141_p2), %v768_v6, 16 }
   0xa   : > { %vm229_vm2 = vcmp.lt.s32.totalorder (!%p141_p2), %v768_v6, 17  ;;  %vm257_vm3 = vcmp.lt.s32.totalorder (!%p141_p2), %v768_v6, 15  ;;  %vm214_vm6 = vcmp.ge.s32.totalorder (!%p141_p2), %v768_v6, 16  ;;  %vm285_vm8 = vcmp.lt.s32.totalorder (!%p141_p2), %v768_v6, 127 }
   0xb   : > { %v201_v9 = vand.u32 (!%p141_p2), 15, %v771_v7  ;;  %vm779_vm4 = vcmp.le.s32.totalorder (!%p141_p2), %v194_v8, 14  ;;  %vm788_vm7 = vcmp.ge.s32.totalorder (!%p141_p2), %v194_v8, 1  ;;  %vm217_vm9 = vcmp.lt.s32.totalorder (!%p141_p2), %v771_v7, 240 }
   0xc   : > { %vm810_vm12 = vmand (!%p141_p2), %vm214_vm6, %vm788_vm7  ;;  %vm313_vm13 = vcmp.lt.s32.totalorder (!%p141_p2), %v768_v6, 112  ;;  %vm298_vm14 = vcmp.lt.s32.totalorder (!%p141_p2), %v768_v6, 113 }
   0xd   : > { %s936_s13 = smov (!%p169_p3, %s615_s13), 1  ;;  %vm783_vm5 = vcmp.ge.s32.totalorder %v201_v9, 1  ;;  %vm794_vm10 = vcmp.le.s32.totalorder %v201_v9, 14  ;;  %vm824_vm15 = vmand %vm214_vm6, %vm779_vm4 }
   0xe   : > { %s637_s14 = sshll.u32 %s936_s13, 2  ;;  %s638_s30 = sshll.u32 %s936_s13, 5 }
   0xf   : > { %s173_s17 = scalar_lea.vmem %s917_s0, %s637_s14  ;;  %s178_s6 = scalar_lea.vmem %s919_s2, %s638_s30 }
  0x10   : > { %v185_v0 = vld [vmem:[%s173_s17] sm:$0xf]  ;;  %s183_s9 = scalar_lea.vmem %s920_s3, %s638_s30 }
  0x11   : > { %v760_v1 = vunpack.c.l.bf16 %v185_v0 }
  0x13   : > { %v764_v2 = vcombine.high %v760_v1, %v760_v1 }
  0x15   : > { %v677_v3 = vpack.i.bf16 %v764_v2, %v760_v1 }
  0x17   : > { %678 = vrot.lane.b32.xlu1 %v677_v3, %s717_s18  ;;  %668 = vrot.lane.b32.xlu0 %v677_v3, %s718_s19 }
  0x1b   : > { %683 = vrot.lane.b32.xlu1 %v677_v3, %s719_s20  ;;  %673 = vrot.lane.b32.xlu0 %v677_v3, %s720_s21 }
  0x1f   : > { %688 = vrot.lane.b32.xlu0 %v677_v3, %s721_s22  ;;  %693 = vrot.lane.b32.xlu1 %v677_v3, %s722_s23 }
  0x23   : > { %698 = vrot.lane.b32.xlu0 %v677_v3, %s723_s24  ;;  %703 = vrot.lane.b32.xlu1 %v677_v3, %s724_s25 }
  0x89   : > { %v679_v10 = vpop.permute.xlu1 %678  ;;  %v669_v11 = vpop.permute.xlu0 %668 }
  0x8a   : > { %v681_v15 = vunpack.i.h.bf16 %v679_v10  ;;  %v680_v16 = vunpack.i.l.bf16 %v679_v10  ;;  %v671_v17 = vunpack.i.h.bf16 %v669_v11  ;;  %v670_v18 = vunpack.i.l.bf16 %v669_v11 }
  0x8c   : > { %v273_v20 = vsel %vm272_vm0, %v670_v18, %v671_v17  ;;  %v274_v21 = vsel %vm272_vm0, %v671_v17, %v670_v18  ;;  %v230_v22 = vsel %vm229_vm2, %v680_v16, %v681_v15  ;;  %v231_v23 = vsel %vm229_vm2, %v681_v15, %v680_v16  ;;  %vm330_vm2 = vmand %vm217_vm9, %vm794_vm10 }
  0x8d   : > { %v684_v25 = vpop.permute.xlu1 %683  ;;  %v674_v26 = vpop.permute.xlu0 %673  ;;  %v280_v27 = vsel %vm783_vm5, %v273_v20, 0.0  ;;  %v279_v28 = vsel %vm788_vm7, %v274_v21, 0.0  ;;  %vm326_vm0 = vcmp.lt.s32.totalorder %v768_v6, 111  ;;  %v239_v34 = vsel %vm783_vm5, %v230_v22, 0.0  ;;  %v708_v6 = vld [vmem:[%s918_s1 + $0x8] sm:$0xff]  }
  0x8e   : > { %v686_v29 = vunpack.i.h.bf16 %v684_v25  ;;  %v685_v30 = vunpack.i.l.bf16 %v684_v25  ;;  %v676_v31 = vunpack.i.h.bf16 %v674_v26  ;;  %v675_v32 = vunpack.i.l.bf16 %v674_v26 }
  0x8f   : > { %v346_v35 = vrot.slane %v280_v27, 4  ;;  %v238_v36 = vsel %vm810_vm12, %v231_v23, 0.0  ;;  %v345_v37 = vrot.slane %v279_v28, 4 }
  0x90   : > { %v245_v38 = vsel %vm244_vm1, %v675_v32, %v676_v31  ;;  %v246_v39 = vsel %vm244_vm1, %v676_v31, %v675_v32  ;;  %v258_v40 = vsel %vm257_vm3, %v685_v30, %v686_v29  ;;  %v259_v41 = vsel %vm257_vm3, %v686_v29, %v685_v30  ;;  %vm868_vm1 = vmand %vm217_vm9, %vm783_vm5  ;;  %v707_v32 = vld [vmem:[%s918_s1] sm:$0xff]  }
  0x91   : > { %v340_v42 = vrot.slane %v245_v38, 4  ;;  %v689_v43 = vpop.permute.xlu0 %688  ;;  %v694_v44 = vpop.permute.xlu1 %693  ;;  %v267_v45 = vsel %vm794_vm10, %v258_v40, 0.0  ;;  %v251_v46 = vsel %vm214_vm6, %v246_v39, 0.0  ;;  %v266_v47 = vsel %vm824_vm15, %v259_v41, 0.0 }
  0x92   : > { %v691_v48 = vunpack.i.h.bf16 %v689_v43  ;;  %v690_v49 = vunpack.i.l.bf16 %v689_v43  ;;  %v696_v50 = vunpack.i.h.bf16 %v694_v44  ;;  %v695_v51 = vunpack.i.l.bf16 %v694_v44 }
  0x93   : > { %v363_v52 = vsel %vm361_vm11, %v239_v34, %v340_v42  ;;  %v365_v53 = vsel %vm361_vm11, %v267_v45, %v346_v35  ;;  %v339_v54 = vrot.slane %v251_v46, 4  ;;  %v364_v55 = vsel %vm361_vm11, %v266_v47, %v345_v37 }
  0x94   : > { %v286_v56 = vsel %vm285_vm8, %v690_v49, %v691_v48  ;;  %v287_v57 = vsel %vm285_vm8, %v691_v48, %v690_v49  ;;  %v314_v58 = vsel %vm313_vm13, %v695_v51, %v696_v50  ;;  %v315_v59 = vsel %vm313_vm13, %v696_v50, %v695_v51 }
  0x95   : > { %v292_v60 = vsel %vm779_vm4, %v286_v56, 0.0  ;;  %v321_v61 = vsel %vm217_vm9, %v315_v59, 0.0  ;;  %v357_v62 = vrot.slane %v314_v58, 4  ;;  %v699_v63 = vpop.permute.xlu0 %698  ;;  %v293_v0 = vsel %vm794_vm10, %v287_v57, 0.0  ;;  %v704_v3 = vpop.permute.xlu1 %703 }
  0x96   : > { %v351_v4 = vrot.slane %v292_v60, 4  ;;  %v358_v5 = vrot.slane %v321_v61, 4  ;;  %v701_v8 = vunpack.i.h.bf16 %v699_v63  ;;  %v700_v9 = vunpack.i.l.bf16 %v699_v63 }
  0x97   : > { %v371_v11 = vpack.c.bf16 %v365_v53, %v363_v52  ;;  %v362_v15 = vsel %vm361_vm11, %v238_v36, %v339_v54  ;;  %v706_v16 = vunpack.i.h.bf16 %v704_v3  ;;  %v705_v17 = vunpack.i.l.bf16 %v704_v3 }
  0x98   : > { %v299_v18 = vsel %vm298_vm14, %v700_v9, %v701_v8  ;;  %v300_v13 = vsel %vm298_vm14, %v701_v8, %v700_v9  ;;  %v370_v20 = vpack.c.bf16 %v364_v55, %v362_v15  ;;  %v352_v21 = vrot.slane %v293_v0, 4 }
  0x99   : > { %404 = vmatprep.subr.bf16.mxu0 %v371_v11  ;;  %644 = vmatprep.subr.bf16.mxu1 %v371_v11  ;;  %v328_v22 = vsel %vm326_vm0, %v706_v16, %v705_v17  ;;  %v308_v19 = vsel %vm868_vm1, %v300_v13, 0.0  ;;  %v307_v7 = vsel %vm788_vm7, %v299_v18, 0.0  ;;  %v366_v23 = vsel %vm361_vm11, %v760_v1, %v351_v4 }
  0x9a   : > { %405 = vmatpush1.bf16.msra.mxu0 %v370_v20  ;;  %647 = vmatpush1.bf16.msra.mxu1 %v370_v20  ;;  %v336_v24 = vsel %vm330_vm2, %v328_v22, 0.0  ;;  %v367_v25 = vsel %vm361_vm11, %v764_v2, %v352_v21  ;;  %v369_v26 = vsel %vm361_vm11, %v308_v19, %v358_v5  ;;  %v368_v27 = vsel %vm361_vm11, %v307_v7, %v357_v62 }
  0x9b   : > { %v373_v28 = vpack.c.bf16 %v369_v26, %v367_v25  ;;  %v372_v29 = vpack.c.bf16 %v368_v27, %v366_v23  ;;  %v375_v30 = vpack.c.bf16 %v336_v24, %v336_v24  ;;  %v327_v14 = vsel %vm326_vm0, %v705_v17, %v706_v16 }
  0x9c   : > { %vm397_vm3 = vcmask 1041408   ;;  %v335_v1 = vsel %vm779_vm4, %v327_v14, 0.0  ;;  %vm390_vm4 = vcmask 293888   ;;  %vm517_vm5 = vcmask 7168  }
  0x9d   : > { %406 = vmatprep.subr.bf16.mxu0 %v373_v28  ;;  %645 = vmatprep.subr.bf16.mxu1 %v373_v28  ;;  %v374_v31 = vpack.c.bf16 %v335_v1, %v335_v1  ;;  %vm522_vm6 = vcmask 15360  }
  0x9e   : > { %407 = vmatpush1.bf16.msra.mxu0 %v372_v29  ;;  %648 = vmatpush1.bf16.msra.mxu1 %v372_v29 }
  0x9f   : > { %628 = vmatprep.subr.msk.bf16.mxu0 %vm397_vm3, %v375_v30  ;;  %646 = vmatprep.subr.msk.bf16.mxu1 %vm397_vm3, %v375_v30  ;;  %v399_v2 = vsel %vm397_vm3, %v374_v31, 0 }
  0xa2   : > { %409 = vmatpush1.bf16.msra.mxu0 %v399_v2  ;;  %649 = vmatpush1.bf16.msra.mxu1 %v399_v2 }
  0xa5   : > { %629 = vmatmul.mubr.msk.bf16.vlgmr.msra.gmra.mrb[0].mxu0 %vm390_vm4, %v707_v32  ;;  %630 = vmatmul.mubr.msk.bf16.vlgmr.msra.gmra.mrb[0].mxu1 %vm390_vm4, %v708_v6 }
 0x178   : > { %v438_v12 = vpop.f32.mrb[0].mxu0  ;;  %v448_v33 = vpop.f32.mrb[0].mxu1 }
 0x179   : > { %v440_v34 = vpop.f32.mrb[1].mxu0  ;;  %v450_v35 = vpop.f32.mrb[1].mxu1  ;;  %v497_v36 = vmul.f32 %v438_v12, %v438_v12  ;;  %v501_v37 = vmul.f32 %v448_v33, %v448_v33 }
 0x17a   : > { %v640_v38 = vpack.c.bf16 %v440_v34, %v438_v12  ;;  %v442_v39 = vpop.f32.mrb[2].mxu0  ;;  %v642_v40 = vpack.c.bf16 %v450_v35, %v448_v33  ;;  %v452_v41 = vpop.f32.mrb[2].mxu1  ;;  %v485_v42 = vadd.f32 %v440_v34, %v438_v12  ;;  %v491_v43 = vadd.f32 %v450_v35, %v448_v33 }
 0x17b   : > { %v444_v44 = vpop.f32.mrb[3].mxu0  ;;  %v454_v45 = vpop.f32.mrb[3].mxu1  ;;  %v498_v46 = vmul.f32 %v440_v34, %v440_v34  ;;  %v502_v47 = vmul.f32 %v450_v35, %v450_v35  ;;  %v499_v48 = vmul.f32 %v442_v39, %v442_v39  ;;  %v503_v49 = vmul.f32 %v452_v41, %v452_v41 }
 0x17c   : > { %481 = vst [vmem:[%s178_s6] sm:$0xff] %v640_v38  ;;  %483 = vst [vmem:[%s178_s6 + $0x10] sm:$0xff] %v642_v40  ;;  %v641_v50 = vpack.c.bf16 %v444_v44, %v442_v39  ;;  %v500_v51 = vmul.f32 %v444_v44, %v444_v44  ;;  %v643_v52 = vpack.c.bf16 %v454_v45, %v452_v41  ;;  %486 = vadd.xlane.f32.xlu0 %v485_v42 }
 0x17d   : > { %v504_v53 = vmul.f32 %v454_v45, %v454_v45  ;;  %v488_v54 = vadd.f32 %v444_v44, %v442_v39  ;;  %v505_v55 = vadd.f32 %v498_v46, %v497_v36  ;;  %v494_v56 = vadd.f32 %v454_v45, %v452_v41 }
 0x17e   : > { %v511_v57 = vadd.f32 %v502_v47, %v501_v37  ;;  %482 = vst [vmem:[%s178_s6 + $0x8] sm:$0xff] %v641_v50  ;;  %484 = vst [vmem:[%s178_s6 + $0x18] sm:$0xff] %v643_v52  ;;  %v508_v58 = vadd.f32 %v500_v51, %v499_v48 }
 0x17f   : > { %v514_v59 = vadd.f32 %v504_v53, %v503_v49  ;;  %489 = vadd.xlane.f32.xlu1 %v488_v54 }
 0x180   : > { %492 = vadd.xlane.f32.xlu0 %v491_v43 }
 0x183   : > { %506 = vadd.xlane.f32.xlu1 %v505_v55 }
 0x184   : > { %495 = vadd.xlane.f32.xlu0 %v494_v56 }
 0x187   : > { %512 = vadd.xlane.f32.xlu1 %v511_v57 }
 0x188   : > { %509 = vadd.xlane.f32.xlu0 %v508_v58 }
 0x18c   : > { %515 = vadd.xlane.f32.xlu0 %v514_v59 }
 0x209   : > { %v487_v60 = vpop.xlane.xlu0 %486 }
 0x20c   : > { %v490_v61 = vpop.xlane.xlu1 %489 }
 0x20d   : > { %v493_v62 = vpop.xlane.xlu0 %492 }
 0x210   : > { %v507_v63 = vpop.xlane.xlu1 %506 }
 0x211   : > { %v518_v0 = vsel %vm517_vm5, %v487_v60, %v507_v63  ;;  %v496_v3 = vpop.xlane.xlu0 %495 }
 0x212   : > { %523 = vst.msk [vmem:[%s183_s9] sm:$0xff] %vm522_vm6, %v518_v0 }
 0x214   : > { %v513_v4 = vpop.xlane.xlu1 %512 }
 0x215   : > { %v520_v5 = vsel %vm517_vm5, %v493_v62, %v513_v4  ;;  %v510_v8 = vpop.xlane.xlu0 %509 }
 0x216   : > { %525 = vst.msk [vmem:[%s183_s9 + $0x10] sm:$0xff] %vm522_vm6, %v520_v5  ;;  %v519_v9 = vsel %vm517_vm5, %v490_v61, %v510_v8 }
 0x217   : > { %524 = vst.msk [vmem:[%s183_s9 + $0x8] sm:$0xff] %vm522_vm6, %v519_v9 }
 0x219   : > { %v516_v10 = vpop.xlane.xlu0 %515 }
 0x21a   : > { %v521_v11 = vsel %vm517_vm5, %v496_v3, %v516_v10 }
 0x21b   : > { %526 = vst.msk [vmem:[%s183_s9 + $0x18] sm:$0xff] %vm522_vm6, %v521_v11 }
 0x21c PF: > { %s14_s12 = sadd.s32 1, %s715_s12  }
 0x21d   : > { %p11_p4 = scmp.ge.s32.totalorder %s14_s12, 4  }
 0x21f   :  { %13 = sbr.rel (!%p11_p4) target bundleno = 1 (0x1), region = 70 }

</bundles_post_ra>
